<compile_context>
chip_gen: v5e
topology: v5e:2x2
jax: 0.10.0
libtpu: 0.0.40
codegen_flags: <defaults>
</compile_context>

<pallas_src>
import functools
import math

import jax
import jax.numpy as jnp
from jax.experimental import pallas as pl
from jax.experimental.pallas import tpu as pltpu


def _round_up(n, m):
    return ((n + m - 1) // m) * m


def _center_loss_kernel(labels_ref, x_ref, c_ref, out_ref, *,
                        true_b, num_classes, tile_b, inv_b, zero_clamp_bias):
    """One batch tile per grid step: out += sum_i clamp(||x_i - centers[y_i]||^2)."""
    t = pl.program_id(0)

    @pl.when(t == 0)
    def _init():
        out_ref[...] = jnp.zeros_like(out_ref)

    x = x_ref[...]                                   # (TB, D) f32
    centers = c_ref[...]                             # (C, D)  f32, resident
    labels = labels_ref[...]                         # (TB, 1) i32

    # Exact one-hot gather of the class centers on the MXU.
    cls = jax.lax.broadcasted_iota(jnp.int32, (tile_b, num_classes), 1)
    onehot = (labels == cls).astype(jnp.float32)     # (TB, C)
    gathered = jnp.dot(onehot, centers,
                       preferred_element_type=jnp.float32)   # (TB, D)

    diff = x - gathered
    d = jnp.sum(diff * diff, axis=1, keepdims=True)  # (TB, 1) per-row squared dist
    d = jnp.clip(d, 1e-12, 1e12)                     # torch clamp on true-class entry

    # Mask out padded tail rows (they must contribute neither dist nor clamp).
    row = t * tile_b + jax.lax.broadcasted_iota(jnp.int32, (tile_b, 1), 0)
    d = jnp.where(row < true_b, d, 0.0)

    out_ref[...] += jnp.sum(d, keepdims=True)        # one (1,1) update per tile

    @pl.when(t == pl.num_programs(0) - 1)
    def _finalize():
        # mean over batch + bias from clamping the B*(C-1) masked zeros to 1e-12
        out_ref[...] = out_ref[...] * inv_b + zero_clamp_bias


def center_loss(x, centers, labels, *, tile_b=256):
    """x: (B, D) f32, centers: (C, D) f32, labels: (B,) int -> scalar f32 loss."""
    B, D = x.shape
    C, Dc = centers.shape
    assert Dc == D

    TB = _round_up(min(tile_b, _round_up(B, 8)), 8)
    B_pad = _round_up(B, TB)
    n_tiles = B_pad // TB

    x_f = x.astype(jnp.float32)
    centers_f = centers.astype(jnp.float32)
    labels_i = labels.astype(jnp.int32).reshape(B, 1)
    if B_pad != B:
        x_f = jnp.pad(x_f, ((0, B_pad - B), (0, 0)))
        labels_i = jnp.pad(labels_i, ((0, B_pad - B), (0, 0)))

    kernel = functools.partial(
        _center_loss_kernel,
        true_b=B,
        num_classes=C,
        tile_b=TB,
        inv_b=float(1.0 / B),
        zero_clamp_bias=float((C - 1) * 1e-12),
    )

    out = pl.pallas_call(
        kernel,
        out_shape=jax.ShapeDtypeStruct((1, 1), jnp.float32),
        grid=(n_tiles,),
        in_specs=[
            pl.BlockSpec((TB, 1), lambda t: (t, 0)),    # labels tile (VMEM)
            pl.BlockSpec((TB, D), lambda t: (t, 0)),    # x tile
            pl.BlockSpec((C, D), lambda t: (0, 0)),     # centers, resident across grid
        ],
        out_specs=pl.BlockSpec((1, 1), lambda t: (0, 0)),
        compiler_params=pltpu.CompilerParams(
            dimension_semantics=("arbitrary",),          # batch-tile axis reduces into out
        ),
    )(labels_i, x_f, centers_f)
    return out[0, 0]


def _center_loss_ref(x, centers, labels):
    """Pure-JAX reference, written exactly like the PyTorch module."""
    B = x.shape[0]
    C = centers.shape[0]
    xx = jnp.sum(x ** 2, axis=1, keepdims=True)
    cc = jnp.sum(centers ** 2, axis=1, keepdims=True).T
    distmat = xx + cc - 2.0 * (x @ centers.T)
    mask = (labels[:, None] == jnp.arange(C)[None, :]).astype(jnp.float32)
    dist = jnp.clip(distmat * mask, 1e-12, 1e12)
    return jnp.sum(dist) / B


if __name__ == "__main__":
    # Module defaults: num_classes=10, feat_dim=2.  Small batch of 8.
    num_classes, feat_dim, batch = 10, 2, 8

    key = jax.random.PRNGKey(0)
    k_x, k_c, k_l = jax.random.split(key, 3)

    x = jax.random.normal(k_x, (batch, feat_dim), dtype=jnp.float32)
    # Deterministic stand-in for the torch.randn(num_classes, feat_dim) parameter.
    centers = jax.random.normal(k_c, (num_classes, feat_dim), dtype=jnp.float32)
    labels = jax.random.randint(k_l, (batch,), 0, num_classes, dtype=jnp.int32)

    loss = center_loss(x, centers, labels)
    jax.block_until_ready(loss)

    ref = _center_loss_ref(x, centers, labels)
    assert jnp.allclose(loss, ref, rtol=1e-5, atol=1e-5), (loss, ref)

    print("KERNEL_OK")
</pallas_src>

<mosaic_0001>
module attributes {stable_mosaic.version = 11 : i64} {
  func.func @_center_loss_kernel(%arg0: i32, %arg1: memref<8x1xi32, #tpu.memory_space<vmem>>, %arg2: memref<8x2xf32, #tpu.memory_space<vmem>>, %arg3: memref<10x2xf32, #tpu.memory_space<vmem>>, %arg4: memref<1x1xf32, #tpu.memory_space<vmem>>) attributes {dimension_semantics = [#tpu.dimension_semantics<arbitrary>], iteration_bounds = array<i64: 1>, scalar_prefetch = 0 : i64, scratch_operands = 0 : i64, tpu.core_type = #tpu.core_type<tc>, window_params = [{transform_indices = @transform_0, window_bounds = array<i64: 8, 1>}, {transform_indices = @transform_1, window_bounds = array<i64: 8, 2>}, {pipeline_mode = #tpu.pipeline_mode<synchronous>, transform_indices = @transform_2, window_bounds = array<i64: 10, 2>}, {pipeline_mode = #tpu.pipeline_mode<synchronous>, transform_indices = @transform_3, window_bounds = array<i64: 1, 1>}]} {
    %c0_i32 = arith.constant 0 : i32
    %0 = arith.cmpi eq, %arg0, %c0_i32 : i32
    %1 = arith.extui %0 : i1 to i32
    %c0_i32_0 = arith.constant 0 : i32
    %2 = arith.cmpi ne, %1, %c0_i32_0 : i32
    scf.if %2 {
      %cst_18 = arith.constant 0.000000e+00 : f32
      %39 = vector.broadcast %cst_18 : f32 to vector<1x1xf32>
      %c0_19 = arith.constant 0 : index
      %c0_20 = arith.constant 0 : index
      %40 = vector.load %arg4[%c0_19, %c0_20] : memref<1x1xf32, #tpu.memory_space<vmem>>, vector<1x1xf32>
      tpu.vector_store %arg4[%c0_19, %c0_20], %39 {strides = array<i32>} : memref<1x1xf32, #tpu.memory_space<vmem>>, vector<1x1xf32>,
    } else {
    }
    %c0 = arith.constant 0 : index
    %c0_1 = arith.constant 0 : index
    %3 = vector.load %arg2[%c0, %c0_1] : memref<8x2xf32, #tpu.memory_space<vmem>>, vector<8x2xf32>
    %c0_2 = arith.constant 0 : index
    %c0_3 = arith.constant 0 : index
    %4 = vector.load %arg3[%c0_2, %c0_3] : memref<10x2xf32, #tpu.memory_space<vmem>>, vector<10x2xf32>
    %c0_4 = arith.constant 0 : index
    %c0_5 = arith.constant 0 : index
    %5 = vector.load %arg1[%c0_4, %c0_5] : memref<8x1xi32, #tpu.memory_space<vmem>>, vector<8x1xi32>
    %6 = tpu.iota {dimensions = array<i32: 1>} : vector<8x10xi32>
    %7 = vector.broadcast %5 : vector<8x1xi32> to vector<8x10xi32>
    %8 = arith.cmpi eq, %7, %6 : vector<8x10xi32>
    %9 = arith.extui %8 : vector<8x10xi1> to vector<8x10xi32>
    %10 = arith.sitofp %9 : vector<8x10xi32> to vector<8x10xf32>
    %cst = arith.constant dense<0.000000e+00> : vector<8x2xf32>
    %11 = tpu.matmul %10, %4, %cst {dimension_numbers = #tpu.dot_dimension_numbers<[1], [0], [0], [1], [0, 0, 1, 1], [], []>} : vector<8x10xf32>, vector<10x2xf32>, vector<8x2xf32> -> vector<8x2xf32>
    %12 = arith.subf %3, %11 : vector<8x2xf32>
    %13 = arith.mulf %12, %12 : vector<8x2xf32>
    %cst_6 = arith.constant dense<0.000000e+00> : vector<8xf32>
    %14 = vector.multi_reduction <add>, %13, %cst_6 [1] : vector<8x2xf32> to vector<8xf32>
    %15 = vector.shape_cast %14 : vector<8xf32> to vector<8x1xf32>
    %cst_7 = arith.constant 9.99999996E-13 : f32
    %cst_8 = arith.constant 9.99999995E+11 : f32
    %16 = vector.broadcast %cst_7 : f32 to vector<8x1xf32>
    %17 = arith.maximumf %16, %15 : vector<8x1xf32>
    %18 = vector.broadcast %cst_8 : f32 to vector<8x1xf32>
    %19 = arith.minimumf %18, %17 : vector<8x1xf32>
    %c8_i32 = arith.constant 8 : i32
    %20 = arith.muli %arg0, %c8_i32 : i32
    %21 = tpu.iota {dimensions = array<i32: 0>} : vector<8x1xi32>
    %22 = vector.broadcast %20 : i32 to vector<8x1xi32>
    %23 = arith.addi %22, %21 : vector<8x1xi32>
    %c8_i32_9 = arith.constant 8 : i32
    %24 = vector.broadcast %c8_i32_9 : i32 to vector<8x1xi32>
    %25 = arith.cmpi slt, %23, %24 : vector<8x1xi32>
    %cst_10 = arith.constant 0.000000e+00 : f32
    %26 = vector.broadcast %cst_10 : f32 to vector<8x1xf32>
    %27 = arith.select %25, %19, %26 : vector<8x1xi1>, vector<8x1xf32>
    %c0_11 = arith.constant 0 : index
    %c0_12 = arith.constant 0 : index
    %28 = vector.load %arg4[%c0_11, %c0_12] : memref<1x1xf32, #tpu.memory_space<vmem>>, vector<1x1xf32>
    %29 = vector.shape_cast %27 : vector<8x1xf32> to vector<1x8x1xf32>
    %cst_13 = arith.constant dense<0.000000e+00> : vector<1xf32>
    %30 = vector.multi_reduction <add>, %29, %cst_13 [1, 2] : vector<1x8x1xf32> to vector<1xf32>
    %31 = vector.shape_cast %30 : vector<1xf32> to vector<1x1x1xf32>
    %32 = vector.extract %31[0, 0, 0] : f32 from vector<1x1x1xf32>
    %33 = vector.broadcast %32 : f32 to vector<1x1xf32>
    %34 = arith.addf %28, %33 : vector<1x1xf32>
    %c0_14 = arith.constant 0 : index
    %c0_15 = arith.constant 0 : index
    %35 = vector.load %arg4[%c0_14, %c0_15] : memref<1x1xf32, #tpu.memory_space<vmem>>, vector<1x1xf32>
    tpu.vector_store %arg4[%c0_14, %c0_15], %34 {strides = array<i32>} : memref<1x1xf32, #tpu.memory_space<vmem>>, vector<1x1xf32>,
    %c0_i32_16 = arith.constant 0 : i32
    %36 = arith.cmpi eq, %arg0, %c0_i32_16 : i32
    %37 = arith.extui %36 : i1 to i32
    %c0_i32_17 = arith.constant 0 : i32
    %38 = arith.cmpi ne, %37, %c0_i32_17 : i32
    scf.if %38 {
      %c0_18 = arith.constant 0 : index
      %c0_19 = arith.constant 0 : index
      %39 = vector.load %arg4[%c0_18, %c0_19] : memref<1x1xf32, #tpu.memory_space<vmem>>, vector<1x1xf32>
      %cst_20 = arith.constant 1.250000e-01 : f32
      %40 = vector.broadcast %cst_20 : f32 to vector<1x1xf32>
      %41 = arith.mulf %39, %40 : vector<1x1xf32>
      %cst_21 = arith.constant 9.000000e-12 : f32
      %42 = vector.broadcast %cst_21 : f32 to vector<1x1xf32>
      %43 = arith.addf %41, %42 : vector<1x1xf32>
      %c0_22 = arith.constant 0 : index
      %c0_23 = arith.constant 0 : index
      %44 = vector.load %arg4[%c0_22, %c0_23] : memref<1x1xf32, #tpu.memory_space<vmem>>, vector<1x1xf32>
      tpu.vector_store %arg4[%c0_22, %c0_23], %43 {strides = array<i32>} : memref<1x1xf32, #tpu.memory_space<vmem>>, vector<1x1xf32>,
    } else {
    }
    return
  }
  func.func @transform_0(%arg0: i32) -> (i32, i32) {
    %c0_i32 = arith.constant 0 : i32
    %c0_i32_0 = arith.constant 0 : i32
    return %arg0, %c0_i32 : i32, i32
  }
  func.func @transform_1(%arg0: i32) -> (i32, i32) {
    %c0_i32 = arith.constant 0 : i32
    %c0_i32_0 = arith.constant 0 : i32
    return %arg0, %c0_i32 : i32, i32
  }
  func.func @transform_2(%arg0: i32) -> (i32, i32) {
    %c0_i32 = arith.constant 0 : i32
    %c0_i32_0 = arith.constant 0 : i32
    %c0_i32_1 = arith.constant 0 : i32
    return %c0_i32, %c0_i32_0 : i32, i32
  }
  func.func @transform_3(%arg0: i32) -> (i32, i32) {
    %c0_i32 = arith.constant 0 : i32
    %c0_i32_0 = arith.constant 0 : i32
    %c0_i32_1 = arith.constant 0 : i32
    return %c0_i32, %c0_i32_0 : i32, i32
  }
}

</mosaic_0001>

<bundles_post_ra>
// kernel: tpu_custom_call.1
= control target key start
LH: loop header
LB: loop body
LE: loop exit
PB: predicated region body
PF: predicated region fallthrough
CT: control target
= control target key end

     0   :  { %s191_s0 = inlined_call_operand.vmem [shape: s32[8,1], index: 0, kind: input, shape index: {}]   ;;  %s192_s1 = inlined_call_operand.vmem [shape: f32[8,2], index: 1, kind: input, shape index: {}]   ;;  %s193_s2 = inlined_call_operand.vmem [shape: f32[10,2], index: 2, kind: input, shape index: {}]   ;;  %s194_s3 = inlined_call_operand.hbm [shape: f32[1,1], index: 3, kind: output, shape index: {}]  }
   0x1   :  { %v24_v0 = vld [vmem:[%s191_s0] sm:$0xff] }
   0x2   :  { %8 = vsyncpa [#allocation3], 0  ;;  %v150_v1 = vmov 0   ;;  %v23_v2 = vld [vmem:[%s193_s2 + $0x8] sm:$0x3]  ;;  %vm37_vm0 = vcmask 1041408   ;;  %v25_v5 = vlaneseq }
   0x3   :  { %123 = vset.pattern.permute.xlu0 %v150_v1  ;;  %vm19_vm1 = vcmask 0   ;;  %116 = vmatpush.msk.msra.mxu0 %vm37_vm0, %v23_v2  ;;  %v151_v3 = vmov 0.0   ;;  %v22_v4 = vld [vmem:[%s193_s2] sm:$0xff]  ;;  %vm33_vm2 = vcmask 80896   ;;  %vm63_vm4 = vcmask 15360   ;;  %s152_s2 = smov [#allocation2]  }
   0x4   :  { %28 = vperm.xlu0 %123, %v24_v0   ;;  %20 = vst.msk [vmem:[#allocation2] sm:$0x1] %vm19_vm1, %v151_v3  ;;  %v26_v6 = vand.u32 127, %v25_v5  ;;  %v21_v9 = vld [vmem:[%s192_s1] sm:$0xff]  ;;  %vm77_vm5 = vcmask 7168   ;;  %s104_s19 = sshll.u32 %s152_s2, 4  ;;  %s105_s19 = int_to_ptr.vmem [resolvable:$true] %s104_s19 }
   0x5   :  { %56 = vmatpush.msra.mxu0 %v22_v4  ;;  %s106_s22 = sshll.u32 %s194_s3, 4  ;;  %s107_s22 = int_to_ptr.hbm [resolvable:$true] %s106_s22 }
   0xb   :  { %v76_v25 = vld [vmem:[#allocation2] sm:$0x1] }
  0x76   :  { %v29_v7 = vpop.permute.xlu0 %28 }
  0x77   :  { %vm30_vm3 = vcmp.eq.s32.totalorder %v29_v7, %v26_v6 }
  0x78   :  { %v115_v8 = vsel %vm30_vm3, 1.0, %v151_v3 }
  0x79   :  { %117 = vmatmul.msk.f32.vlgmr.msra.gmra.mxu0 %vm33_vm2, %v115_v8 }
  0xf6   :  { %v58_v10 = vpop.f32.mrf.mxu0 }
  0xf7   :  { %v61_v11 = vsub.f32 %v21_v9, %v58_v10 }
  0xf9   :  { %v62_v12 = vmul.f32 %v61_v11, %v61_v11 }
  0xfb   :  { %v64_v13 = vsel %vm63_vm4, %v62_v12, 0.0 }
  0xfc   :  { %65 = vadd.xlane.f32.xlu0 %v64_v13 }
 0x16f   :  { %v66_v14 = vpop.xlane.xlu0 %65 }
 0x170   :  { %v67_v15 = vmax.f32 %v66_v14, 1e-12 }
 0x172   :  { %v68_v16 = vmin.f32 %v67_v15, 1e+12 }
 0x174   :  { %v78_v17 = vsel %vm77_vm5, %v68_v16, 0.0 }
 0x175   :  { %79 = vadd.xlane.f32.xlu1 %v78_v17 }
 0x1e8   :  { %v80_v18 = vpop.xlane.xlu1 %79 }
 0x1e9   :  { %v81_v19 = vrot.slane %v80_v18, 4 }
 0x1eb   :  { %v82_v20 = vadd.f32 %v81_v19, %v80_v18 }
 0x1ed   :  { %v83_v21 = vrot.slane %v82_v20, 2 }
 0x1ef   :  { %v84_v22 = vadd.f32 %v83_v21, %v82_v20 }
 0x1f1   :  { %v85_v23 = vrot.slane %v84_v22, 1 }
 0x1f3   :  { %v86_v24 = vadd.f32 %v85_v23, %v84_v22 }
 0x1f5   :  { %118 = vpush %v86_v24 }
 0x226   :  { %s119_s1 = spop %118 }
 0x227   :  { %v88_v26 = vstv %s119_s1 }
 0x228   :  { %v89_v27 = vadd.f32 %v88_v26, %v76_v25 }
 0x22a   :  { %91 = vst.msk [vmem:[#allocation2] sm:$0x1] %vm19_vm1, %v89_v27 }
 0x231   :  { %v95_v28 = vld [vmem:[#allocation2] sm:$0x1] }
 0x232   :  { %v96_v29 = vmul.f32 0.125, %v95_v28 }
 0x234   :  { %v97_v30 = vadd.f32 9e-12, %v96_v29 }
 0x236   :  { %98 = vst.msk [vmem:[#allocation2] sm:$0x1] %vm19_vm1, %v97_v30 }
 0x237   :  { %109 = dma.vmem_to_hbm [thread:$0]  %s105_s19, 16, %s107_s22, [#allocation3]  }
 0x238   :  { %148 = dma.done.wait [#allocation3], 16  }
 0x239   :  { %149 = vsyncadd [#allocation3], 4294967280 }
 0x23a   :  { %114 = vsyncpa [#allocation3], 1 }

</bundles_post_ra>
